<compile_context>
chip_gen: v5e
topology: v5e:2x2
jax: 0.10.0
libtpu: 0.0.40
codegen_flags: <defaults>
</compile_context>

<pallas_src>
import jax
import jax.numpy as jnp
import numpy as np
from jax.experimental import pallas as pl
from jax.experimental.pallas import tpu as pltpu


def _round_up(x, m):
    return ((x + m - 1) // m) * m


# ------------------------------ Pallas kernel ------------------------------ #
def _ca_net_kernel(x_ref, w_ref, b_ref, eps_ref,
                   c_ref, mu_ref, lv_ref, acc_ref):
    # x_ref:   (tm, tk)   bf16      w_ref: (tk, 2*Np) bf16
    # b_ref:   (1, 2*Np)  f32       eps_ref: (tm, Np) f32
    # c/mu/lv: (tm, Np)   f32       acc_ref: (tm, 2*Np) f32 scratch
    k = pl.program_id(1)

    @pl.when(k == 0)
    def _():
        acc_ref[...] = jnp.zeros_like(acc_ref)

    acc_ref[...] += jnp.dot(x_ref[...], w_ref[...],
                            preferred_element_type=jnp.float32)

    @pl.when(k == pl.num_programs(1) - 1)
    def _():
        half = mu_ref.shape[-1]                       # Np (multiple of 128)
        y = jnp.maximum(acc_ref[...] + b_ref[...], 0.0)   # ReLU(fc)
        mu = y[:, :half]
        lv = y[:, half:]
        c = eps_ref[...] * jnp.exp(0.5 * lv) + mu         # reparametrize
        mu_ref[...] = mu.astype(mu_ref.dtype)
        lv_ref[...] = lv.astype(lv_ref.dtype)
        c_ref[...] = c.astype(c_ref.dtype)


# -------------------------------- wrapper ---------------------------------- #
def ca_net_forward(text_embedding, w, b, eps, *, c_dim):
    """CA_NET forward.

    text_embedding: (B, t_dim) f32
    w: (2*c_dim, t_dim) f32 (torch nn.Linear layout), b: (2*c_dim,) f32
    eps: (B, c_dim) f32 standard-normal noise
    returns (c_code, mu, logvar), each (B, c_dim) f32.
    """
    B, K = text_embedding.shape
    assert w.shape == (2 * c_dim, K) and b.shape == (2 * c_dim,)
    assert eps.shape == (B, c_dim)

    # Tiling: rows padded to a sublane multiple, c_dim padded to a lane-dense
    # 128 multiple (Np), K tiled so the reduction grid divides evenly.
    tm = min(256, max(8, _round_up(B, 8)))
    Np = _round_up(c_dim, 128)
    tk = min(512, _round_up(K, 128))
    Mp = _round_up(B, tm)
    Kp = _round_up(K, tk)

    # torch (out, in) -> (in, out); pack mu / logvar halves side by side, each
    # padded to Np lanes, into one (Kp, 2*Np) bf16 weight slab.
    w_t = jnp.transpose(w)                                           # (K, 2c)
    w_mu = jnp.pad(w_t[:, :c_dim].astype(jnp.bfloat16),
                   ((0, Kp - K), (0, Np - c_dim)))
    w_lv = jnp.pad(w_t[:, c_dim:].astype(jnp.bfloat16),
                   ((0, Kp - K), (0, Np - c_dim)))
    w_p = jnp.concatenate([w_mu, w_lv], axis=1)                      # (Kp, 2Np)

    b_mu = jnp.pad(b[:c_dim], (0, Np - c_dim))
    b_lv = jnp.pad(b[c_dim:], (0, Np - c_dim))
    b_p = jnp.concatenate([b_mu, b_lv]).reshape(1, 2 * Np)

    xb = jnp.pad(text_embedding.astype(jnp.bfloat16),
                 ((0, Mp - B), (0, Kp - K)))
    eps_p = jnp.pad(eps, ((0, Mp - B), (0, Np - c_dim)))

    grid = (Mp // tm, Kp // tk)            # reduction (K) axis last

    c_code, mu, logvar = pl.pallas_call(
        _ca_net_kernel,
        out_shape=(jax.ShapeDtypeStruct((Mp, Np), jnp.float32),
                   jax.ShapeDtypeStruct((Mp, Np), jnp.float32),
                   jax.ShapeDtypeStruct((Mp, Np), jnp.float32)),
        grid_spec=pltpu.PrefetchScalarGridSpec(
            num_scalar_prefetch=0,
            grid=grid,
            in_specs=[
                pl.BlockSpec((tm, tk), lambda i, k: (i, k)),      # x row/K tile
                pl.BlockSpec((tk, 2 * Np), lambda i, k: (k, 0)),  # packed W tile
                pl.BlockSpec((1, 2 * Np), lambda i, k: (0, 0)),   # packed bias
                pl.BlockSpec((tm, Np), lambda i, k: (i, 0)),      # eps
            ],
            out_specs=[
                pl.BlockSpec((tm, Np), lambda i, k: (i, 0)),      # c_code
                pl.BlockSpec((tm, Np), lambda i, k: (i, 0)),      # mu
                pl.BlockSpec((tm, Np), lambda i, k: (i, 0)),      # logvar
            ],
            scratch_shapes=[pltpu.VMEM((tm, 2 * Np), jnp.float32)],
        ),
        compiler_params=pltpu.CompilerParams(
            dimension_semantics=("parallel", "arbitrary"),
            vmem_limit_bytes=32 * 1024 * 1024),
    )(xb, w_p, b_p, eps_p)

    return (c_code[:B, :c_dim], mu[:B, :c_dim], logvar[:B, :c_dim])


# ---------------------------- pure-JAX reference ---------------------------- #
def ref_forward(text_embedding, w, b, eps, *, c_dim):
    xb = text_embedding.astype(jnp.bfloat16)
    wb = w.astype(jnp.bfloat16)
    y = jnp.dot(xb, wb.T, preferred_element_type=jnp.float32) + b
    y = jnp.maximum(y, 0.0)
    mu = y[:, :c_dim]
    logvar = y[:, c_dim:]
    c_code = eps * jnp.exp(0.5 * logvar) + mu
    return c_code, mu, logvar


# ----------------------------------- main ----------------------------------- #
if __name__ == "__main__":
    key = jax.random.PRNGKey(0)

    B = 4
    text_dim, video_len = 64, 4          # cfg.TEXT.DIMENSION, cfg.VIDEO_LEN
    t_dim = text_dim * video_len         # 256
    c_dim = 32                           # cfg.GAN.CONDITION_DIM (small synthetic)

    key, kx, kw, kb, ke = jax.random.split(key, 5)
    text_embedding = jax.random.normal(kx, (B, t_dim), jnp.float32)
    w = 0.02 * jax.random.normal(kw, (2 * c_dim, t_dim), jnp.float32)
    b = 0.01 * jax.random.normal(kb, (2 * c_dim,), jnp.float32)
    eps = jax.random.normal(ke, (B, c_dim), jnp.float32)

    c_code, mu, logvar = jax.block_until_ready(
        ca_net_forward(text_embedding, w, b, eps, c_dim=c_dim))

    assert c_code.shape == (B, c_dim), c_code.shape
    assert mu.shape == (B, c_dim) and logvar.shape == (B, c_dim)

    rc, rm, rl = jax.block_until_ready(
        ref_forward(text_embedding, w, b, eps, c_dim=c_dim))
    np.testing.assert_allclose(np.asarray(mu), np.asarray(rm), rtol=1e-3, atol=1e-3)
    np.testing.assert_allclose(np.asarray(logvar), np.asarray(rl), rtol=1e-3, atol=1e-3)
    np.testing.assert_allclose(np.asarray(c_code), np.asarray(rc), rtol=1e-3, atol=1e-3)

    print("KERNEL_OK")
</pallas_src>

<mosaic_0001>
module attributes {stable_mosaic.version = 11 : i64} {
  func.func @_ca_net_kernel(%arg0: i32, %arg1: i32, %arg2: memref<8x256xbf16, #tpu.memory_space<vmem>>, %arg3: memref<256x256xbf16, #tpu.memory_space<vmem>>, %arg4: memref<1x256xf32, #tpu.memory_space<vmem>>, %arg5: memref<8x128xf32, #tpu.memory_space<vmem>>, %arg6: memref<8x128xf32, #tpu.memory_space<vmem>>, %arg7: memref<8x128xf32, #tpu.memory_space<vmem>>, %arg8: memref<8x128xf32, #tpu.memory_space<vmem>>, %arg9: memref<8x256xf32, #tpu.memory_space<vmem>>) attributes {dimension_semantics = [#tpu.dimension_semantics<parallel>, #tpu.dimension_semantics<arbitrary>], iteration_bounds = array<i64: 1, 1>, scalar_prefetch = 0 : i64, scratch_operands = 1 : i64, tpu.core_type = #tpu.core_type<tc>, window_params = [{transform_indices = @transform_0, window_bounds = array<i64: 8, 256>}, {transform_indices = @transform_1, window_bounds = array<i64: 256, 256>}, {pipeline_mode = #tpu.pipeline_mode<synchronous>, transform_indices = @transform_2, window_bounds = array<i64: 1, 256>}, {transform_indices = @transform_3, window_bounds = array<i64: 8, 128>}, {transform_indices = @transform_4, window_bounds = array<i64: 8, 128>}, {transform_indices = @transform_5, window_bounds = array<i64: 8, 128>}, {transform_indices = @transform_6, window_bounds = array<i64: 8, 128>}]} {
    %c0_i32 = arith.constant 0 : i32
    %0 = arith.cmpi eq, %arg1, %c0_i32 : i32
    %1 = arith.extui %0 : i1 to i32
    %c0_i32_0 = arith.constant 0 : i32
    %2 = arith.cmpi ne, %1, %c0_i32_0 : i32
    scf.if %2 {
      %cst_10 = arith.constant 0.000000e+00 : f32
      %12 = vector.broadcast %cst_10 : f32 to vector<8x256xf32>
      %c0_11 = arith.constant 0 : index
      %c0_12 = arith.constant 0 : index
      %13 = vector.load %arg9[%c0_11, %c0_12] : memref<8x256xf32, #tpu.memory_space<vmem>>, vector<8x256xf32>
      tpu.vector_store %arg9[%c0_11, %c0_12], %12 {strides = array<i32>} : memref<8x256xf32, #tpu.memory_space<vmem>>, vector<8x256xf32>,
    } else {
    }
    %c0 = arith.constant 0 : index
    %c0_1 = arith.constant 0 : index
    %3 = vector.load %arg9[%c0, %c0_1] : memref<8x256xf32, #tpu.memory_space<vmem>>, vector<8x256xf32>
    %c0_2 = arith.constant 0 : index
    %c0_3 = arith.constant 0 : index
    %4 = vector.load %arg2[%c0_2, %c0_3] : memref<8x256xbf16, #tpu.memory_space<vmem>>, vector<8x256xbf16>
    %c0_4 = arith.constant 0 : index
    %c0_5 = arith.constant 0 : index
    %5 = vector.load %arg3[%c0_4, %c0_5] : memref<256x256xbf16, #tpu.memory_space<vmem>>, vector<256x256xbf16>
    %cst = arith.constant dense<0.000000e+00> : vector<8x256xf32>
    %6 = tpu.matmul %4, %5, %cst {dimension_numbers = #tpu.dot_dimension_numbers<[1], [0], [0], [1], [0, 0, 1, 1], [], []>} : vector<8x256xbf16>, vector<256x256xbf16>, vector<8x256xf32> -> vector<8x256xf32>
    %7 = arith.addf %3, %6 : vector<8x256xf32>
    %c0_6 = arith.constant 0 : index
    %c0_7 = arith.constant 0 : index
    %8 = vector.load %arg9[%c0_6, %c0_7] : memref<8x256xf32, #tpu.memory_space<vmem>>, vector<8x256xf32>
    tpu.vector_store %arg9[%c0_6, %c0_7], %7 {strides = array<i32>} : memref<8x256xf32, #tpu.memory_space<vmem>>, vector<8x256xf32>,
    %c0_i32_8 = arith.constant 0 : i32
    %9 = arith.cmpi eq, %arg1, %c0_i32_8 : i32
    %10 = arith.extui %9 : i1 to i32
    %c0_i32_9 = arith.constant 0 : i32
    %11 = arith.cmpi ne, %10, %c0_i32_9 : i32
    scf.if %11 {
      %c0_10 = arith.constant 0 : index
      %c0_11 = arith.constant 0 : index
      %12 = vector.load %arg9[%c0_10, %c0_11] : memref<8x256xf32, #tpu.memory_space<vmem>>, vector<8x256xf32>
      %c0_12 = arith.constant 0 : index
      %c0_13 = arith.constant 0 : index
      %13 = vector.load %arg4[%c0_12, %c0_13] : memref<1x256xf32, #tpu.memory_space<vmem>>, vector<1x256xf32>
      %14 = vector.broadcast %13 : vector<1x256xf32> to vector<8x256xf32>
      %15 = arith.addf %12, %14 : vector<8x256xf32>
      %cst_14 = arith.constant 0.000000e+00 : f32
      %16 = vector.broadcast %cst_14 : f32 to vector<8x256xf32>
      %17 = arith.maximumf %15, %16 : vector<8x256xf32>
      %18 = vector.extract_strided_slice %17 {offsets = [0, 0], sizes = [8, 128], strides = [1, 1]} : vector<8x256xf32> to vector<8x128xf32>
      %19 = vector.extract_strided_slice %17 {offsets = [0, 128], sizes = [8, 128], strides = [1, 1]} : vector<8x256xf32> to vector<8x128xf32>
      %c0_15 = arith.constant 0 : index
      %c0_16 = arith.constant 0 : index
      %20 = vector.load %arg5[%c0_15, %c0_16] : memref<8x128xf32, #tpu.memory_space<vmem>>, vector<8x128xf32>
      %cst_17 = arith.constant 5.000000e-01 : f32
      %21 = vector.broadcast %cst_17 : f32 to vector<8x128xf32>
      %22 = arith.mulf %21, %19 : vector<8x128xf32>
      %23 = math.exp %22 : vector<8x128xf32>
      %24 = arith.mulf %20, %23 : vector<8x128xf32>
      %25 = arith.addf %24, %18 : vector<8x128xf32>
      %c0_18 = arith.constant 0 : index
      %c0_19 = arith.constant 0 : index
      %26 = vector.load %arg7[%c0_18, %c0_19] : memref<8x128xf32, #tpu.memory_space<vmem>>, vector<8x128xf32>
      tpu.vector_store %arg7[%c0_18, %c0_19], %18 {strides = array<i32>} : memref<8x128xf32, #tpu.memory_space<vmem>>, vector<8x128xf32>,
      %c0_20 = arith.constant 0 : index
      %c0_21 = arith.constant 0 : index
      %27 = vector.load %arg8[%c0_20, %c0_21] : memref<8x128xf32, #tpu.memory_space<vmem>>, vector<8x128xf32>
      tpu.vector_store %arg8[%c0_20, %c0_21], %19 {strides = array<i32>} : memref<8x128xf32, #tpu.memory_space<vmem>>, vector<8x128xf32>,
      %c0_22 = arith.constant 0 : index
      %c0_23 = arith.constant 0 : index
      %28 = vector.load %arg6[%c0_22, %c0_23] : memref<8x128xf32, #tpu.memory_space<vmem>>, vector<8x128xf32>
      tpu.vector_store %arg6[%c0_22, %c0_23], %25 {strides = array<i32>} : memref<8x128xf32, #tpu.memory_space<vmem>>, vector<8x128xf32>,
    } else {
    }
    return
  }
  func.func @transform_0(%arg0: i32, %arg1: i32) -> (i32, i32) {
    %c0_i32 = arith.constant 0 : i32
    return %arg0, %arg1 : i32, i32
  }
  func.func @transform_1(%arg0: i32, %arg1: i32) -> (i32, i32) {
    %c0_i32 = arith.constant 0 : i32
    %c0_i32_0 = arith.constant 0 : i32
    return %arg1, %c0_i32 : i32, i32
  }
  func.func @transform_2(%arg0: i32, %arg1: i32) -> (i32, i32) {
    %c0_i32 = arith.constant 0 : i32
    %c0_i32_0 = arith.constant 0 : i32
    %c0_i32_1 = arith.constant 0 : i32
    return %c0_i32, %c0_i32_0 : i32, i32
  }
  func.func @transform_3(%arg0: i32, %arg1: i32) -> (i32, i32) {
    %c0_i32 = arith.constant 0 : i32
    %c0_i32_0 = arith.constant 0 : i32
    return %arg0, %c0_i32 : i32, i32
  }
  func.func @transform_4(%arg0: i32, %arg1: i32) -> (i32, i32) {
    %c0_i32 = arith.constant 0 : i32
    %c0_i32_0 = arith.constant 0 : i32
    return %arg0, %c0_i32 : i32, i32
  }
  func.func @transform_5(%arg0: i32, %arg1: i32) -> (i32, i32) {
    %c0_i32 = arith.constant 0 : i32
    %c0_i32_0 = arith.constant 0 : i32
    return %arg0, %c0_i32 : i32, i32
  }
  func.func @transform_6(%arg0: i32, %arg1: i32) -> (i32, i32) {
    %c0_i32 = arith.constant 0 : i32
    %c0_i32_0 = arith.constant 0 : i32
    return %arg0, %c0_i32 : i32, i32
  }
}

</mosaic_0001>

<bundles_post_ra>
// kernel: tpu_custom_call.1
= control target key start
LH: loop header
LB: loop body
LE: loop exit
PB: predicated region body
PF: predicated region fallthrough
CT: control target
= control target key end

     0   :  { %12 = vsyncpa [#allocation4], 0  ;;  %s831_s0 = inlined_call_operand.hbm [shape: bf16[8,256], index: 0, kind: input, shape index: {}]   ;;  %s832_s1 = inlined_call_operand.hbm [shape: bf16[256,256], index: 1, kind: input, shape index: {}]   ;;  %s833_s2 = inlined_call_operand.hbm [shape: f32[1,256], index: 2, kind: input, shape index: {}]   ;;  %s834_s3 = inlined_call_operand.hbm [shape: f32[8,128], index: 3, kind: input, shape index: {}]   ;;  %s835_s4 = inlined_call_operand.hbm [shape: f32[8,128], index: 4, kind: output, shape index: {0}]   ;;  %s836_s5 = inlined_call_operand.hbm [shape: f32[8,128], index: 5, kind: output, shape index: {1}]   ;;  %s837_s6 = inlined_call_operand.hbm [shape: f32[8,128], index: 6, kind: output, shape index: {2}]  }
   0x1   :  { %13 = vsyncpa [#allocation7], 0 }
   0x2   :  { %14 = vsyncpa [#allocation10], 0 }
   0x3   :  { %15 = vsyncpa [#allocation5], 0  ;;  %s32_s23 = sshll.u32 %s832_s1, 4  ;;  %s33_s23 = int_to_ptr.hbm [resolvable:$true] %s32_s23 }
   0x4   :  { %16 = vsyncpa [#allocation13], 0  ;;  %s766_s24 = smov [#allocation6]   ;;  %s22_s28 = sshll.u32 %s831_s0, 4  ;;  %s23_s28 = int_to_ptr.hbm [resolvable:$true] %s22_s28 }
   0x5   :  { %s34_s25 = sshll.u32 %s766_s24, 4  ;;  %s767_s29 = smov 128   ;;  %s35_s25 = int_to_ptr.vmem [resolvable:$true] %s34_s25 }
   0x6   :  { %s768_s30 = smov 8   ;;  %s769_s7 = smov [#allocation3]  }
   0x7   :  { %40 = dma.hbm_to_vmem [thread:$0]  %s33_s23, 4096, %s35_s25, [#allocation7], %s767_s29, %s767_s29, %s768_s30  }
   0x8   :  { %s24_s8 = sshll.u32 %s769_s7, 4  ;;  %s46_s11 = sshll.u32 %s833_s2, 4  ;;  %s25_s8 = int_to_ptr.vmem [resolvable:$true] %s24_s8  ;;  %s47_s11 = int_to_ptr.hbm [resolvable:$true] %s46_s11 }
   0x9   :  { %27 = dma.hbm_to_vmem [thread:$0]  %s23_s28, 128, %s25_s8, [#allocation4]  }
   0xa   :  { %s57_s13 = sshll.u32 %s834_s3, 4  ;;  %s770_s14 = smov [#allocation8]   ;;  %s58_s13 = int_to_ptr.hbm [resolvable:$true] %s57_s13 }
   0xb   :  { %s48_s15 = sshll.u32 %s770_s14, 4  ;;  %s771_s0 = smov [#allocation9]   ;;  %s49_s15 = int_to_ptr.vmem [resolvable:$true] %s48_s15 }
   0xc   :  { %51 = dma.hbm_to_vmem [thread:$0]  %s47_s11, 32, %s49_s15, [#allocation7]  }
   0xd   :  { %s59_s16 = sshll.u32 %s771_s0, 4  ;;  %s60_s16 = int_to_ptr.vmem [resolvable:$true] %s59_s16 }
   0xe   :  { %62 = dma.hbm_to_vmem [thread:$0]  %s58_s13, 128, %s60_s16, [#allocation10]  }
   0xf   :  { %756 = dma.done.wait [#allocation4], 128  }
  0x10   :  { %757 = vsyncadd [#allocation4], 4294967168 }
  0x11   :  { %758 = dma.done.wait [#allocation7], 4128  }
  0x12   :  { %759 = vsyncadd [#allocation7], 4294963168 }
  0x13   :  { %760 = dma.done.wait [#allocation10], 128  }
  0x14   :  { %761 = vsyncadd [#allocation10], 4294967168  ;;  %v559_v0 = vld [vmem:[#allocation6 + $0x74] sm:$0xf]  ;;  %v477_v1 = vld [vmem:[#allocation6 + $0x78] sm:$0xf0] }
  0x15   :  { %v575_v2 = vld [vmem:[#allocation6 + $0xf4] sm:$0xf]  ;;  %v480_v3 = vor.u32 %v559_v0, %v477_v1  ;;  %v541_v4 = vld [vmem:[#allocation6 + $0xf8] sm:$0xf0]  ;;  %v557_v5 = vld [vmem:[#allocation6 + $0x64] sm:$0xf] }
  0x16   :  { %v469_v6 = vld [vmem:[#allocation6 + $0x68] sm:$0xf0]  ;;  %v544_v7 = vor.u32 %v575_v2, %v541_v4  ;;  %v573_v8 = vld [vmem:[#allocation6 + $0xe4] sm:$0xf]  ;;  %v555_v11 = vld [vmem:[#allocation6 + $0x54] sm:$0xf] }
  0x17   :  { %v533_v9 = vld [vmem:[#allocation6 + $0xe8] sm:$0xf0]  ;;  %313 = vmatpush.bf16.msra.mxu2 %v480_v3  ;;  %v472_v10 = vor.u32 %v557_v5, %v469_v6  ;;  %v461_v12 = vld [vmem:[#allocation6 + $0x58] sm:$0xf0]  ;;  %v475_v14 = vld [vmem:[#allocation6 + $0x70] sm:$0xf] }
  0x18   :  { %326 = vmatpush.bf16.msra.mxu3 %v544_v7  ;;  %v536_v13 = vor.u32 %v573_v8, %v533_v9  ;;  %v560_v15 = vld [vmem:[#allocation6 + $0x74] sm:$0xf0]  ;;  %v539_v16 = vld [vmem:[#allocation6 + $0xf0] sm:$0xf]  ;;  %v571_v17 = vld [vmem:[#allocation6 + $0xd4] sm:$0xf]  ;;  %v464_v23 = vor.u32 %v555_v11, %v461_v12 }
  0x19   :  { %v525_v18 = vld [vmem:[#allocation6 + $0xd8] sm:$0xf0]  ;;  %v476_v19 = vor.u32 %v560_v15, %v475_v14  ;;  %v576_v20 = vld [vmem:[#allocation6 + $0xf4] sm:$0xf0]  ;;  %v467_v22 = vld [vmem:[#allocation6 + $0x60] sm:$0xf] }
  0x1a   :  { %v540_v21 = vor.u32 %v576_v20, %v539_v16  ;;  %v558_v24 = vld [vmem:[#allocation6 + $0x64] sm:$0xf0]  ;;  %v531_v25 = vld [vmem:[#allocation6 + $0xe0] sm:$0xf]  ;;  %v528_v27 = vor.u32 %v571_v17, %v525_v18  ;;  %v553_v28 = vld [vmem:[#allocation6 + $0x44] sm:$0xf] }
  0x1b   :  { %314 = vmatpush.bf16.msra.mxu2 %v472_v10  ;;  %287 = vmatpush.bf16.msra.mxu0 %v476_v19  ;;  %v574_v26 = vld [vmem:[#allocation6 + $0xe4] sm:$0xf0]  ;;  %v453_v29 = vld [vmem:[#allocation6 + $0x48] sm:$0xf0]  ;;  %v569_v30 = vld [vmem:[#allocation6 + $0xc4] sm:$0xf]  ;;  %v468_v31 = vor.u32 %v558_v24, %v467_v22 }
  0x1c   :  { %327 = vmatpush.bf16.msra.mxu3 %v536_v13  ;;  %300 = vmatpush.bf16.msra.mxu1 %v540_v21  ;;  %v532_v32 = vor.u32 %v574_v26, %v531_v25  ;;  %v517_v33 = vld [vmem:[#allocation6 + $0xc8] sm:$0xf0]  ;;  %v459_v34 = vld [vmem:[#allocation6 + $0x50] sm:$0xf]  ;;  %v556_v35 = vld [vmem:[#allocation6 + $0x54] sm:$0xf0]  ;;  %v456_v38 = vor.u32 %v553_v28, %v453_v29 }
  0x1d   :  { %v523_v36 = vld [vmem:[#allocation6 + $0xd0] sm:$0xf]  ;;  %v572_v37 = vld [vmem:[#allocation6 + $0xd4] sm:$0xf0]  ;;  %v551_v39 = vld [vmem:[#allocation6 + $0x34] sm:$0xf]  ;;  %v460_v41 = vor.u32 %v556_v35, %v459_v34  ;;  %v520_v42 = vor.u32 %v569_v30, %v517_v33 }
  0x1e   :  { %v445_v40 = vld [vmem:[#allocation6 + $0x38] sm:$0xf0]  ;;  %v567_v43 = vld [vmem:[#allocation6 + $0xb4] sm:$0xf]  ;;  %v524_v44 = vor.u32 %v572_v37, %v523_v36  ;;  %v451_v45 = vld [vmem:[#allocation6 + $0x40] sm:$0xf] }
  0x1f   :  { %315 = vmatpush.bf16.msra.mxu2 %v464_v23  ;;  %288 = vmatpush.bf16.msra.mxu0 %v468_v31  ;;  %v554_v46 = vld [vmem:[#allocation6 + $0x44] sm:$0xf0]  ;;  %v509_v47 = vld [vmem:[#allocation6 + $0xb8] sm:$0xf0]  ;;  %v515_v48 = vld [vmem:[#allocation6 + $0xc0] sm:$0xf]  ;;  %v448_v50 = vor.u32 %v551_v39, %v445_v40 }
  0x20   :  { %328 = vmatpush.bf16.msra.mxu3 %v528_v27  ;;  %301 = vmatpush.bf16.msra.mxu1 %v532_v32  ;;  %v570_v49 = vld [vmem:[#allocation6 + $0xc4] sm:$0xf0]  ;;  %v549_v51 = vld [vmem:[#allocation6 + $0x24] sm:$0xf]  ;;  %v437_v52 = vld [vmem:[#allocation6 + $0x28] sm:$0xf0]  ;;  %v452_v53 = vor.u32 %v554_v46, %v451_v45  ;;  %v512_v54 = vor.u32 %v567_v43, %v509_v47 }
  0x21   :  { %v565_v55 = vld [vmem:[#allocation6 + $0xa4] sm:$0xf]  ;;  %v516_v56 = vor.u32 %v570_v49, %v515_v48  ;;  %v443_v57 = vld [vmem:[#allocation6 + $0x30] sm:$0xf]  ;;  %v552_v58 = vld [vmem:[#allocation6 + $0x34] sm:$0xf0]  ;;  %v440_v62 = vor.u32 %v549_v51, %v437_v52 }
  0x22   :  { %v501_v59 = vld [vmem:[#allocation6 + $0xa8] sm:$0xf0]  ;;  %v507_v60 = vld [vmem:[#allocation6 + $0xb0] sm:$0xf]  ;;  %v568_v61 = vld [vmem:[#allocation6 + $0xb4] sm:$0xf0]  ;;  %v444_v1 = vor.u32 %v552_v58, %v443_v57 }
  0x23   :  { %316 = vmatpush.bf16.msra.mxu2 %v456_v38  ;;  %289 = vmatpush.bf16.msra.mxu0 %v460_v41  ;;  %v547_v63 = vld [vmem:[#allocation6 + $0x14] sm:$0xf]  ;;  %v429_v0 = vld [vmem:[#allocation6 + $0x18] sm:$0xf0]  ;;  %v504_v2 = vor.u32 %v565_v55, %v501_v59  ;;  %v508_v4 = vor.u32 %v568_v61, %v507_v60  ;;  %v435_v5 = vld [vmem:[#allocation6 + $0x20] sm:$0xf] }
  0x24   :  { %329 = vmatpush.bf16.msra.mxu3 %v520_v42  ;;  %302 = vmatpush.bf16.msra.mxu1 %v524_v44  ;;  %v563_v3 = vld [vmem:[#allocation6 + $0x94] sm:$0xf]  ;;  %v550_v6 = vld [vmem:[#allocation6 + $0x24] sm:$0xf0]  ;;  %v493_v7 = vld [vmem:[#allocation6 + $0x98] sm:$0xf0]  ;;  %v432_v10 = vor.u32 %v547_v63, %v429_v0 }
  0x25   :  { %v499_v8 = vld [vmem:[#allocation6 + $0xa0] sm:$0xf]  ;;  %v566_v9 = vld [vmem:[#allocation6 + $0xa4] sm:$0xf0]  ;;  %v545_v11 = vld [vmem:[#allocation6 + $0x4] sm:$0xf]  ;;  %v436_v13 = vor.u32 %v550_v6, %v435_v5  ;;  %v496_v15 = vor.u32 %v563_v3, %v493_v7 }
  0x26   :  { %v421_v12 = vld [vmem:[#allocation6 + $0x8] sm:$0xf0]  ;;  %v87_v14 = vld [vmem:[#allocation3] sm:$0xff]  ;;  %v561_v16 = vld [vmem:[#allocation6 + $0x84] sm:$0xf]  ;;  %v500_v17 = vor.u32 %v566_v9, %v499_v8  ;;  %s772_s2 = smov [#allocation12]  }
  0x27   :  { %317 = vmatpush.bf16.msra.mxu2 %v448_v50  ;;  %290 = vmatpush.bf16.msra.mxu0 %v452_v53  ;;  %v427_v18 = vld [vmem:[#allocation6 + $0x10] sm:$0xf]  ;;  %v548_v19 = vld [vmem:[#allocation6 + $0x14] sm:$0xf0]  ;;  %v485_v20 = vld [vmem:[#allocation6 + $0x88] sm:$0xf0]  ;;  %v121_v23 = vunpack.c.l.b16 %v87_v14  ;;  %v424_v24 = vor.u32 %v545_v11, %v421_v12  ;;  %v122_v25 = vunpack.c.h.b16 %v87_v14 }
  0x28   :  { %330 = vmatpush.bf16.msra.mxu3 %v512_v54  ;;  %303 = vmatpush.bf16.msra.mxu1 %v516_v56  ;;  %v491_v21 = vld [vmem:[#allocation6 + $0x90] sm:$0xf]  ;;  %v564_v22 = vld [vmem:[#allocation6 + $0x94] sm:$0xf0]  ;;  %v428_v26 = vor.u32 %v548_v19, %v427_v18  ;;  %v488_v27 = vor.u32 %v561_v16, %v485_v20  ;;  %v419_v29 = vld [vmem:[#allocation6] sm:$0xf] }
  0x29   :  { %v492_v28 = vor.u32 %v564_v22, %v491_v21  ;;  %v546_v30 = vld [vmem:[#allocation6 + $0x4] sm:$0xf0]  ;;  %v483_v31 = vld [vmem:[#allocation6 + $0x80] sm:$0xf]  ;;  %v123_v33 = vpack.c.b16 %v121_v23, %v121_v23  ;;  %v124_v34 = vpack.c.b16 %v122_v25, %v122_v25  ;;  %s383_s3 = sshll.u32 %s772_s2, 4  ;;  %s385_s19 = sshll.u32 %s836_s5, 4  ;;  %s384_s3 = int_to_ptr.vmem [resolvable:$true] %s383_s3  ;;  %s386_s19 = int_to_ptr.hbm [resolvable:$true] %s385_s19 }
  0x2a   :  { %v562_v32 = vld [vmem:[#allocation6 + $0x84] sm:$0xf0]  ;;  %v420_v35 = vor.u32 %v546_v30, %v419_v29  ;;  %v348_v37 = vld [vmem:[#allocation8] sm:$0x3]  ;;  %s773_s20 = smov [#allocation14]   ;;  %s396_s24 = sshll.u32 %s837_s6, 4  ;;  %s397_s24 = int_to_ptr.hbm [resolvable:$true] %s396_s24 }
  0x2b   :  { %318 = vmatpush.bf16.msra.mxu2 %v440_v62  ;;  %291 = vmatpush.bf16.msra.mxu0 %v444_v1  ;;  %v484_v36 = vor.u32 %v562_v32, %v483_v31  ;;  %v350_v39 = vperm.slane %v348_v37, 0  ;;  %v351_v42 = vperm.slane %v348_v37, 1  ;;  %s394_s21 = sshll.u32 %s773_s20, 4  ;;  %v358_v56 = vld [vmem:[#allocation9] sm:$0xff]  ;;  %s774_s5 = smov [#allocation11]   ;;  %s395_s21 = int_to_ptr.vmem [resolvable:$true] %s394_s21 }
  0x2c   :  { %331 = vmatpush.bf16.msra.mxu3 %v504_v2  ;;  %304 = vmatpush.bf16.msra.mxu1 %v508_v4  ;;  %s372_s6 = sshll.u32 %s774_s5, 4  ;;  %s374_s27 = sshll.u32 %s835_s4, 4  ;;  %s373_s6 = int_to_ptr.vmem [resolvable:$true] %s372_s6  ;;  %s375_s27 = int_to_ptr.hbm [resolvable:$true] %s374_s27 }
  0x2f   :  { %319 = vmatpush.bf16.msra.mxu2 %v432_v10  ;;  %292 = vmatpush.bf16.msra.mxu0 %v436_v13 }
  0x30   :  { %332 = vmatpush.bf16.msra.mxu3 %v496_v15  ;;  %305 = vmatpush.bf16.msra.mxu1 %v500_v17 }
  0x33   :  { %320 = vmatpush.bf16.msra.mxu2 %v424_v24  ;;  %293 = vmatpush.bf16.msra.mxu0 %v428_v26 }
  0x34   :  { %333 = vmatpush.bf16.msra.mxu3 %v488_v27  ;;  %306 = vmatpush.bf16.msra.mxu1 %v492_v28 }
  0x36   :  { %321 = vmatmul.bf16.vlgmr.msra.gmra.mxu2 %v123_v33 }
  0x37   :  { %334 = vmatmul.bf16.vlgmr.msra.gmra.mxu3 %v124_v34  ;;  %294 = vmatpush.bf16.msra.mxu0 %v420_v35 }
  0x38   :  { %307 = vmatpush.bf16.msra.mxu1 %v484_v36 }
  0x3a   :  { %295 = vmatmul.bf16.vlgmr.msra.gmra.mxu0 %v123_v33 }
  0x3b   :  { %308 = vmatmul.bf16.vlgmr.msra.gmra.mxu1 %v124_v34 }
  0xb7   :  { %v296_v38 = vpop.f32.mrf.mxu0 }
  0xb8   :  { %v309_v40 = vpop.f32.mrf.mxu1 }
  0xb9   :  { %v322_v41 = vpop.f32.mrf.mxu2  ;;  %v310_v43 = vadd.f32 %v309_v40, %v296_v38 }
  0xba   :  { %v335_v44 = vpop.f32.mrf.mxu3 }
  0xbb   :  { %v336_v45 = vadd.f32 %v335_v44, %v322_v41  ;;  %v354_v46 = vadd.f32 %v350_v39, %v310_v43 }
  0xbd   :  { %v355_v47 = vadd.f32 %v351_v42, %v336_v45  ;;  %v356_v48 = vmax.f32 %v354_v46, 0.0 }
  0xbf   :  { %v357_v49 = vmax.f32 %v355_v47, 0.0  ;;  %364 = vst [vmem:[#allocation12] sm:$0xff] %v356_v48  ;;  %v298_v50 = vpop.f32.mrf.mxu0 }
  0xc0   :  { %v311_v51 = vpop.f32.mrf.mxu1  ;;  %388 = dma.vmem_to_hbm [thread:$0]  %s384_s3, 128, %s386_s19, [#allocation13]  }
  0xc1   :  { %v359_v52 = vmul.f32 0.5, %v357_v49  ;;  %365 = vst [vmem:[#allocation14] sm:$0xff] %v357_v49  ;;  %v324_v53 = vpop.f32.mrf.mxu2 }
  0xc2   :  { %v337_v54 = vpop.f32.mrf.mxu3  ;;  %399 = dma.vmem_to_hbm [thread:$0]  %s395_s21, 128, %s397_s24, [#allocation13]  }
  0xc3   :  { %v360_v55 = vmul.f32 1.442695, %v359_v52 }
  0xc5   :  { %586 = vpow2.f32 %v360_v55 }
  0xcb   :  { %v587_v57 = vpop.eup %586 }
  0xcc   :  { %v362_v58 = vmul.f32 %v587_v57, %v358_v56 }
  0xce   :  { %v363_v59 = vadd.f32 %v362_v58, %v356_v48 }
  0xd0   :  { %366 = vst [vmem:[#allocation11] sm:$0xff] %v363_v59 }
  0xd1   :  { %377 = dma.vmem_to_hbm [thread:$0]  %s373_s6, 128, %s375_s27, [#allocation5]  }
  0xd2   :  { %762 = dma.done.wait [#allocation5], 128  }
  0xd3   :  { %763 = vsyncadd [#allocation5], 4294967168 }
  0xd4   :  { %764 = dma.done.wait [#allocation13], 256  }
  0xd5   :  { %765 = vsyncadd [#allocation13], 4294967040 }
  0xd6   :  { %412 = vsyncpa [#allocation4], 1 }
  0xd7   :  { %413 = vsyncpa [#allocation7], 1 }
  0xd8   :  { %414 = vsyncpa [#allocation10], 1 }
  0xd9   :  { %415 = vsyncpa [#allocation5], 1 }
  0xda   :  { %416 = vsyncpa [#allocation13], 1 }

</bundles_post_ra>
